<compile_context>
chip_gen: v7x
topology: tpu7x:2x2x1
jax: 0.10.0
libtpu: 0.0.40
codegen_flags: <defaults>
</compile_context>

<pallas_src>
import functools

import jax
import jax.numpy as jnp
from jax import lax
from jax.experimental import pallas as pl
from jax.experimental.pallas import tpu as pltpu


# ---------------------------------------------------------------------------
# Kernel bodies
# ---------------------------------------------------------------------------

def _clip_and_store(w, o_ref):
    """Shared epilogue: row-sum clip + rescale, then store."""
    clip = jnp.abs(jnp.sum(w, axis=-1, keepdims=True))
    scaler = jnp.where(clip > 10000.0,
                       10000.0 * pl.reciprocal(clip, approx=True),
                       jnp.ones_like(clip))
    o_ref[...] = (scaler * w).astype(o_ref.dtype)


def _multi_copy_kernel(lam_ref, a_ref, b_ref, o_ref):
    """Both sides carry n_q copies; q is already folded into K = n_q*q_dim.

    a_ref: (Bblk, M, K), b_ref: (Bblk, N, K), lam_ref: (1, K) with
    lam_k[q*D+d] = lambda[q] / (n_q*q_dim).
    """
    a = a_ref[...] * lam_ref[...]            # fold lambda & 1/(n_q*q_dim) into LHS
    w = lax.dot_general(
        a, b_ref[...],
        dimension_numbers=(((2,), (2,)), ((0,), (0,))),   # contract K, batch Bblk
        preferred_element_type=jnp.float32)               # (Bblk, M, N) on MXU
    _clip_and_store(w, o_ref)


def _broadcast_kernel(in_is_single, n_q, lam_ref, s_ref, m_ref, o_ref):
    """One side has a single copy.

    s_ref: (Bblk, P_single, D) — the squeezed single-copy side.
    m_ref: (Bblk, n_q, P_multi, D) — the multi-copy side.
    lam_ref: SMEM (n_q,) already scaled by 1/(n_q*q_dim).
    """
    m = m_ref[...]
    reduced = lam_ref[0] * m[:, 0]
    for q in range(1, n_q):                    # static unroll over n_q copies
        reduced = reduced + lam_ref[q] * m[:, q]   # (Bblk, P_multi, D)
    s = s_ref[...]
    lhs, rhs = (s, reduced) if in_is_single else (reduced, s)
    w = lax.dot_general(
        lhs, rhs,
        dimension_numbers=(((2,), (2,)), ((0,), (0,))),
        preferred_element_type=jnp.float32)    # (Bblk, M, N)
    _clip_and_store(w, o_ref)


# ---------------------------------------------------------------------------
# Wrapper
# ---------------------------------------------------------------------------

def _pick_block_b(B, per_batch_bytes, vmem_budget=8 << 20):
    """Largest divisor of B that fits the VMEM budget and leaves >=2 grid steps."""
    cap = max(1, min(B, vmem_budget // max(per_batch_bytes, 1)))
    if B >= 2:
        cap = max(1, min(cap, B // 2))   # >=2 grid steps -> both v7x TCs get work
    for d in range(cap, 0, -1):
        if B % d == 0:
            return d
    return 1


def path_integral(in_subsystem, out_subsystem, lambda_copies, *, n_q, q_dim):
    """in_subsystem: (B, nq_in, M, q_dim); out_subsystem: (B, nq_out, N, q_dim).
    nq_in / nq_out must each be n_q or 1. Returns (B, M, N) float32."""
    B, nq_in, M, D = in_subsystem.shape
    B2, nq_out, N, D2 = out_subsystem.shape
    assert B == B2 and D == D2 == q_dim
    assert nq_in in (1, n_q) and nq_out in (1, n_q)

    inv_scale = 1.0 / float(n_q * q_dim)
    lam = lambda_copies.reshape(n_q).astype(jnp.float32) * inv_scale

    if nq_in == n_q and nq_out == n_q:
        # Collapse the copy axis into the contraction axis: K = n_q * q_dim.
        # Wrapper-side transpose/reshape is pure layout plumbing.
        K = n_q * D
        a = jnp.transpose(in_subsystem, (0, 2, 1, 3)).reshape(B, M, K)
        b = jnp.transpose(out_subsystem, (0, 2, 1, 3)).reshape(B, N, K)
        lam_k = jnp.repeat(lam, D).reshape(1, K)

        per_batch = 4 * (M * K + N * K + M * N)
        bblk = _pick_block_b(B, per_batch)
        grid = (B // bblk,)

        kernel = _multi_copy_kernel
        operands = (lam_k, a, b)
        in_specs = [
            pl.BlockSpec((1, K), lambda i: (0, 0)),
            pl.BlockSpec((bblk, M, K), lambda i: (i, 0, 0)),
            pl.BlockSpec((bblk, N, K), lambda i: (i, 0, 0)),
        ]
    elif (nq_in == 1) != (nq_out == 1):
        # Broadcast branch: lambda-reduce the multi-copy side inside the kernel,
        # then a single contraction over D per block.
        in_is_single = (nq_in == 1)
        single = in_subsystem[:, 0] if in_is_single else out_subsystem[:, 0]
        multi = out_subsystem if in_is_single else in_subsystem
        p_single = single.shape[1]
        p_multi = multi.shape[2]

        per_batch = 4 * (p_single * D + n_q * p_multi * D + M * N)
        bblk = _pick_block_b(B, per_batch)
        grid = (B // bblk,)

        kernel = functools.partial(_broadcast_kernel, in_is_single, n_q)
        operands = (lam, single, multi)
        in_specs = [
            pl.BlockSpec(memory_space=pltpu.MemorySpace.SMEM),        # lam (n_q,)
            pl.BlockSpec((bblk, p_single, D), lambda i: (i, 0, 0)),
            pl.BlockSpec((bblk, n_q, p_multi, D), lambda i: (i, 0, 0, 0)),
        ]
    else:
        raise ValueError("unsupported copy-axis combination")

    grid_spec = pltpu.PrefetchScalarGridSpec(
        num_scalar_prefetch=0,
        grid=grid,
        in_specs=in_specs,
        out_specs=pl.BlockSpec((bblk, M, N), lambda i: (i, 0, 0)),
    )

    return pl.pallas_call(
        kernel,
        out_shape=jax.ShapeDtypeStruct((B, M, N), jnp.float32),
        grid_spec=grid_spec,
        compiler_params=pltpu.CompilerParams(dimension_semantics=("parallel",)),
    )(*operands)


# ---------------------------------------------------------------------------
# Pure-JAX reference (all three PyTorch branches collapse to this)
# ---------------------------------------------------------------------------

def path_integral_ref(in_subsystem, out_subsystem, lambda_copies, *, n_q, q_dim):
    B, _, M, D = in_subsystem.shape
    N = out_subsystem.shape[2]
    ins = jnp.broadcast_to(in_subsystem, (B, n_q, M, D))
    outs = jnp.broadcast_to(out_subsystem, (B, n_q, N, D))
    dist = jnp.einsum('bqmd,bqnd->bqmn', ins, outs)
    w = (dist * lambda_copies.reshape(1, n_q, 1, 1)).sum(1) / (n_q * q_dim)
    clip = jnp.abs(w.sum(-1, keepdims=True))
    scaler = jnp.where(clip > 10000.0, 10000.0 / clip, jnp.ones_like(clip))
    return scaler * w


# ---------------------------------------------------------------------------
# Self-test
# ---------------------------------------------------------------------------

if __name__ == "__main__":
    key = jax.random.PRNGKey(0)
    k_lam, k_in, k_out, k_in1, k_out1 = jax.random.split(key, 5)

    B, n_q, M, N, q_dim = 2, 4, 8, 8, 32

    # PyTorch: nn.Parameter(torch.randn(n_q, 1, 1)).
    lambda_copies = jax.random.normal(k_lam, (n_q,), dtype=jnp.float32)

    # Case 3: both sides carry n_q copies.
    in_s = jax.random.normal(k_in, (B, n_q, M, q_dim), dtype=jnp.float32)
    out_s = jax.random.normal(k_out, (B, n_q, N, q_dim), dtype=jnp.float32)
    got = jax.block_until_ready(
        path_integral(in_s, out_s, lambda_copies, n_q=n_q, q_dim=q_dim))
    want = path_integral_ref(in_s, out_s, lambda_copies, n_q=n_q, q_dim=q_dim)
    assert got.shape == (B, M, N)
    assert jnp.allclose(got, want, atol=1e-4, rtol=1e-4)

    # Case 1: in has a single copy, out has n_q copies.
    in_s1 = jax.random.normal(k_in1, (B, 1, M, q_dim), dtype=jnp.float32)
    got1 = jax.block_until_ready(
        path_integral(in_s1, out_s, lambda_copies, n_q=n_q, q_dim=q_dim))
    want1 = path_integral_ref(in_s1, out_s, lambda_copies, n_q=n_q, q_dim=q_dim)
    assert jnp.allclose(got1, want1, atol=1e-4, rtol=1e-4)

    # Case 2: in has n_q copies, out has a single copy.
    out_s1 = jax.random.normal(k_out1, (B, 1, N, q_dim), dtype=jnp.float32)
    got2 = jax.block_until_ready(
        path_integral(in_s, out_s1, lambda_copies, n_q=n_q, q_dim=q_dim))
    want2 = path_integral_ref(in_s, out_s1, lambda_copies, n_q=n_q, q_dim=q_dim)
    assert jnp.allclose(got2, want2, atol=1e-4, rtol=1e-4)

    print("KERNEL_OK")
</pallas_src>

<mosaic_0001>
module attributes {stable_mosaic.version = 11 : i64} {
  func.func @_multi_copy_kernel(%arg0: i32, %arg1: memref<1x128xf32, #tpu.memory_space<vmem>>, %arg2: memref<1x8x128xf32, #tpu.memory_space<vmem>>, %arg3: memref<1x8x128xf32, #tpu.memory_space<vmem>>, %arg4: memref<1x8x8xf32, #tpu.memory_space<vmem>>) attributes {dimension_semantics = [#tpu.dimension_semantics<parallel>], iteration_bounds = array<i64: 2>, scalar_prefetch = 0 : i64, scratch_operands = 0 : i64, tpu.core_type = #tpu.core_type<tc>, window_params = [{pipeline_mode = #tpu.pipeline_mode<synchronous>, transform_indices = @transform_0, window_bounds = array<i64: 1, 128>}, {transform_indices = @transform_1, window_bounds = array<i64: 1, 8, 128>}, {transform_indices = @transform_2, window_bounds = array<i64: 1, 8, 128>}, {transform_indices = @transform_3, window_bounds = array<i64: 1, 8, 8>}]} {
    %c0 = arith.constant 0 : index
    %c0_0 = arith.constant 0 : index
    %c0_1 = arith.constant 0 : index
    %0 = vector.load %arg2[%c0, %c0_0, %c0_1] : memref<1x8x128xf32, #tpu.memory_space<vmem>>, vector<1x8x128xf32>
    %c0_2 = arith.constant 0 : index
    %c0_3 = arith.constant 0 : index
    %1 = vector.load %arg1[%c0_2, %c0_3] : memref<1x128xf32, #tpu.memory_space<vmem>>, vector<1x128xf32>
    %2 = vector.shape_cast %1 : vector<1x128xf32> to vector<1x1x128xf32>
    %3 = vector.broadcast %2 : vector<1x1x128xf32> to vector<1x8x128xf32>
    %4 = arith.mulf %0, %3 : vector<1x8x128xf32>
    %c0_4 = arith.constant 0 : index
    %c0_5 = arith.constant 0 : index
    %c0_6 = arith.constant 0 : index
    %5 = vector.load %arg3[%c0_4, %c0_5, %c0_6] : memref<1x8x128xf32, #tpu.memory_space<vmem>>, vector<1x8x128xf32>
    %cst = arith.constant dense<0.000000e+00> : vector<1x8x8xf32>
    %6 = tpu.matmul %4, %5, %cst {dimension_numbers = #tpu.dot_dimension_numbers<[2], [2], [1], [1], [0, 0, 0, 1, 1, 1], [0], [0]>} : vector<1x8x128xf32>, vector<1x8x128xf32>, vector<1x8x8xf32> -> vector<1x8x8xf32>
    %cst_7 = arith.constant dense<0.000000e+00> : vector<1x8xf32>
    %7 = vector.multi_reduction <add>, %6, %cst_7 [2] : vector<1x8x8xf32> to vector<1x8xf32>
    %8 = vector.shape_cast %7 : vector<1x8xf32> to vector<1x8x1xf32>
    %9 = math.absf %8 : vector<1x8x1xf32>
    %cst_8 = arith.constant 1.000000e+04 : f32
    %10 = vector.broadcast %cst_8 : f32 to vector<1x8x1xf32>
    %11 = arith.cmpf ogt, %9, %10 : vector<1x8x1xf32>
    %12 = tpu.reciprocal %9 {approx = true} : vector<1x8x1xf32> -> vector<1x8x1xf32>
    %cst_9 = arith.constant 1.000000e+04 : f32
    %13 = vector.broadcast %cst_9 : f32 to vector<1x8x1xf32>
    %14 = arith.mulf %13, %12 : vector<1x8x1xf32>
    %cst_10 = arith.constant 1.000000e+00 : f32
    %15 = vector.broadcast %cst_10 : f32 to vector<1x8x1xf32>
    %16 = arith.select %11, %14, %15 : vector<1x8x1xi1>, vector<1x8x1xf32>
    %17 = vector.broadcast %16 : vector<1x8x1xf32> to vector<1x8x8xf32>
    %18 = arith.mulf %17, %6 : vector<1x8x8xf32>
    %c0_11 = arith.constant 0 : index
    %c0_12 = arith.constant 0 : index
    %c0_13 = arith.constant 0 : index
    %19 = vector.load %arg4[%c0_11, %c0_12, %c0_13] : memref<1x8x8xf32, #tpu.memory_space<vmem>>, vector<1x8x8xf32>
    tpu.vector_store %arg4[%c0_11, %c0_12, %c0_13], %18 {strides = array<i32>} : memref<1x8x8xf32, #tpu.memory_space<vmem>>, vector<1x8x8xf32>,
    return
  }
  func.func @transform_0(%arg0: i32) -> (i32, i32) {
    %c0_i32 = arith.constant 0 : i32
    %c0_i32_0 = arith.constant 0 : i32
    %c0_i32_1 = arith.constant 0 : i32
    return %c0_i32, %c0_i32_0 : i32, i32
  }
  func.func @transform_1(%arg0: i32) -> (i32, i32, i32) {
    %c0_i32 = arith.constant 0 : i32
    %c0_i32_0 = arith.constant 0 : i32
    %c0_i32_1 = arith.constant 0 : i32
    return %arg0, %c0_i32, %c0_i32_0 : i32, i32, i32
  }
  func.func @transform_2(%arg0: i32) -> (i32, i32, i32) {
    %c0_i32 = arith.constant 0 : i32
    %c0_i32_0 = arith.constant 0 : i32
    %c0_i32_1 = arith.constant 0 : i32
    return %arg0, %c0_i32, %c0_i32_0 : i32, i32, i32
  }
  func.func @transform_3(%arg0: i32) -> (i32, i32, i32) {
    %c0_i32 = arith.constant 0 : i32
    %c0_i32_0 = arith.constant 0 : i32
    %c0_i32_1 = arith.constant 0 : i32
    return %arg0, %c0_i32, %c0_i32_0 : i32, i32, i32
  }
}

</mosaic_0001>

<bundles_post_ra>
// kernel: tpu_custom_call.1
= control target key start
LH: loop header
LB: loop body
LE: loop exit
PB: predicated region body
PF: predicated region fallthrough
CT: control target
= control target key end

     0   :  { %8 = vsyncpa [#allocation3], 0  ;;  %s960_s0 = inlined_call_operand.hbm [shape: f32[1,128], index: 0, kind: input, shape index: {}]   ;;  %s961_s1 = inlined_call_operand.hbm [shape: f32[2,8,128], index: 1, kind: input, shape index: {}]   ;;  %s962_s2 = inlined_call_operand.hbm [shape: f32[2,8,128], index: 2, kind: input, shape index: {}]   ;;  %s963_s3 = inlined_call_operand.hbm [shape: f32[2,8,8], index: 3, kind: output, shape index: {}]  }
   0x1   :  { %9 = vsyncpa [#allocation6], 0 }
   0x2   :  { %11 = vsyncpa [#allocation6 + $0x1], 0 }
   0x3   :  { %12 = vsyncpa [#allocation4], 0 }
   0x4   :  { %14 = vsyncpa [#allocation4 + $0x1], 0  ;;  %s717_s12 = smov 0   ;;  %s719_s13 = smov 0  }
   0x5   :  { %s721_s14 = smov 0   ;;  %s723_s15 = smov 0  }
   0x6 LB: > { %s738_s16 = sadd.s32 1, %s689_s15   ;;  %s48_s17 = sadd.s32 1, %s685_s14  ;;  %s689_s15 = sphi %s723_s15, %s988_s15   ;;  %s685_s14 = sphi %s721_s14, %s987_s14   ;;  %s681_s13 = sphi %s719_s13, %s986_s13   ;;  %s677_s12 = sphi %s717_s12, %s985_s12  }
   0x7   : > { %s45_s18 = ssub.s32 %s689_s15, %s738_s16  ;;  %p55_p0 = scmp.ne.s32.totalorder %s685_s14, %s681_s13 }
   0x8   : > { %p46_p1 = scmp.eq.s32.totalorder %s45_s18, 0  ;;  %p56_p2 = scmp.eq.s32.totalorder %s689_s15, 0 }
   0x9   : > { %p491_p4 = scmp.lt.s32.totalorder %s689_s15, 2  ;;  %s148_s20 = sand.u32 1, %s689_s15  }
   0xa   : > { %s749_s19 = scalar_select %p46_p1, %s685_s14, %s48_s17  }
   0xb   : > { %p57_p5 = por %p56_p2, %p55_p0  ;;  %s150_s21 = sand.u32 1, %s685_s14  }
   0xc   : > { %s756_s22 = sshll.u32 %s150_s21, 3  ;;  %s445_s23 = sshll.u32 %s689_s15, 7 }
   0xd   : > { %s764_s26 = scalar_lea.hbm %s961_s1, %s445_s23  ;;  %s152_s27 = scalar_lea.vmem [#allocation5], %s756_s22 }
   0xe   : > { %s159_s28 = sshll.u32 %s152_s27, 4  ;;  %p767_p6 = pnand %p491_p4, %p57_p5  ;;  %s771_s28 = int_to_ptr.vmem [resolvable:$true] %s159_s28 }
   0xf   : > { %s773_s30 = scalar_lea.sflag [#allocation6], %s148_s20  ;;  %s531_s4 = scalar_lea.hbm %s764_s26, 128 }
  0x10   : > { %p532_p7 = scmp.ne.s32.totalorder %s764_s26, %s531_s4  ;;  %p533_p8 = pneg %p767_p6 }
  0x11   : > { %s536_s7 = scalar_lea.hbm %s961_s1, 256  ;;  %p537_p11 = scmp.lt.u32.totalorder %s764_s26, %s961_s1 }
  0x12   : > { %p534_p9 = pnand %p533_p8, %p532_p7  ;;  %p538_p12 = scmp.lt.u32.totalorder %s536_s7, %s531_s4 }
  0x13   : > { %p540_p1 = scmp.lt.u32.totalorder %s531_s4, %s764_s26 }
  0x14   : > { %p535_p10 = pneg %p534_p9  ;;  %p539_p13 = por %p538_p12, %p537_p11 }
  0x16   : > { %p541_p2 = por %p540_p1, %p539_p13 }
  0x18   : > { %p542_p4 = pnand %p541_p2, %p535_p10 }
  0x1a   : > { %545 = shalt.err (!%p542_p4)
}
  0x1b   : > { %s546_s10 = scalar_lea.vmem %s771_s28, 128  ;;  %s691_s11 = smov [#allocation5]  }
  0x1c   : > { %p547_p5 = scmp.ne.s32.totalorder %s771_s28, %s546_s10  ;;  %s551_s17 = sshll.u32 %s691_s11, 4  ;;  %s552_s17 = int_to_ptr.vmem [resolvable:$false] %s551_s17 }
  0x1d   : > { %s553_s18 = scalar_lea.vmem %s552_s17, 256  ;;  %p554_p3 = scmp.lt.s32.totalorder %s771_s28, %s552_s17 }
  0x1e   : > { %p549_p7 = pnand %p547_p5, %p533_p8  ;;  %p555_p11 = scmp.lt.s32.totalorder %s553_s18, %s546_s10 }
  0x20   : > { %p550_p9 = pneg %p549_p7  ;;  %p556_p12 = por %p555_p11, %p554_p3 }
  0x22   : > { %p557_p13 = pnand %p556_p12, %p550_p9 }
  0x24   : > { %560 = shalt.err (!%p557_p13)
}
  0x25   : > { %482 = dma.hbm_to_vmem [thread:$0]  (!%p767_p6), %s764_s26, 128, %s771_s28, %s773_s30  }
  0x26   : > { %s802_s20 = sadd.s32 4294967295, %s689_s15   ;;  %s440_s21 = sadd.s32 4294967294, %s689_s15  }
  0x27   : > { %p61_p3 = scmp.ne.s32.totalorder %s681_s13, %s677_s12  ;;  %p964_p10 = scmp.eq.s32.totalorder %s802_s20, 0 }
  0x28   : > { %p111_p1 = scmp.eq.s32.totalorder %s802_s20, 1  ;;  %p117_p2 = scmp.eq.s32.totalorder %s440_s21, 1 }
  0x29   : > { %p811_p4 = por %p964_p10, %p61_p3  ;;  %p441_p5 = scmp.ge.s32.totalorder %s689_s15, 1 }
  0x2a   : > { %p819_p7 = por %p111_p1, %p55_p0  ;;  %p823_p9 = por %p117_p2, %p61_p3 }
  0x2b   : > { %s970_s24 = scalar_select %p811_p4, 1, 0 }
  0x2c   : > { %s971_s25 = scalar_select %p819_p7, 1, 0 }
  0x2d   : > { %s972_s26 = scalar_select %p823_p9, 1, 0 }
  0x2e   : > { %p124_p11 = scmp.lt.s32.totalorder %s689_s15, 3  ;;  %s170_s27 = scalar_lea.vmem [#allocation7], %s756_s22 }
  0x2f   : > { %s177_s28 = sshll.u32 %s170_s27, 4  ;;  %s834_s6 = scalar_lea.hbm %s962_s2, %s445_s23  ;;  %s178_s28 = int_to_ptr.vmem [resolvable:$true] %s177_s28 }
  0x30   : > { %p836_p0 = pnand %p441_p5, %p124_p11  ;;  %s692_s8 = smov [#allocation2]  }
  0x31   : > { %s840_s9 = sshll.u32 %s692_s8, 4  ;;  %s561_s22 = scalar_lea.hbm %s834_s6, 128  ;;  %s138_s9 = int_to_ptr.vmem [resolvable:$true] %s840_s9 }
  0x32   : > { %s973_s7 = scalar_select %p836_p0, 1, 0 }
  0x33   : > { %p562_p13 = scmp.ne.s32.totalorder %s834_s6, %s561_s22  ;;  %s566_s11 = scalar_lea.hbm %s962_s2, 256 }
  0x34   : > { %p567_p2 = scmp.lt.u32.totalorder %s834_s6, %s962_s2  ;;  %p568_p5 = scmp.lt.u32.totalorder %s566_s11, %s561_s22 }
  0x35   : > { %p564_p3 = pnand %p562_p13, %p533_p8  ;;  %p570_p10 = scmp.lt.u32.totalorder %s561_s22, %s834_s6 }
  0x36   : > { %p569_p11 = por %p568_p5, %p567_p2 }
  0x37   : > { %p565_p1 = pneg %p564_p3 }
  0x38   : > { %p571_p9 = por %p570_p10, %p569_p11 }
  0x3a   : > { %p572_p7 = pnand %p571_p9, %p565_p1 }
  0x3c   : > { %575 = shalt.err (!%p572_p7)
}
  0x3d   : > { %s576_s21 = scalar_lea.vmem %s178_s28, 128  ;;  %s693_s27 = smov [#allocation7]  }
  0x3e   : > { %p577_p12 = scmp.ne.s32.totalorder %s178_s28, %s576_s21  ;;  %s581_s4 = sshll.u32 %s693_s27, 4  ;;  %s582_s4 = int_to_ptr.vmem [resolvable:$false] %s581_s4 }
  0x3f   : > { %s583_s5 = scalar_lea.vmem %s582_s4, 256  ;;  %p584_p4 = scmp.lt.s32.totalorder %s178_s28, %s582_s4 }
  0x40   : > { %p579_p13 = pnand %p577_p12, %p533_p8  ;;  %p585_p0 = scmp.lt.s32.totalorder %s583_s5, %s576_s21 }
  0x42   : > { %p580_p3 = pneg %p579_p13  ;;  %p586_p2 = por %p585_p0, %p584_p4 }
  0x44   : > { %p587_p5 = pnand %p586_p2, %p580_p3 }
  0x46   : > { %590 = shalt.err (!%p587_p5)
}
  0x47   : > { %485 = dma.hbm_to_vmem [thread:$0]  (!%p767_p6), %s834_s6, 128, %s178_s28, %s773_s30  }
  0x48   : > { %p974_p8 = scmp.eq.s32.totalorder %s802_s20, 0  ;;  %p975_p10 = scmp.ne.s32.totalorder %s973_s7, 0 }
  0x49   : > { %s591_s10 = scalar_lea.hbm %s960_s0, 16 }
  0x4a   : > { %p976_p7 = pneg %p975_p10  ;;  %p592_p4 = scmp.ne.s32.totalorder %s960_s0, %s591_s10 }
  0x4b   : > { %p598_p1 = scmp.lt.u32.totalorder %s591_s10, %s960_s0 }
  0x4c   : > { %p870_p9 = pnand %p976_p7, %p974_p8 }
  0x4e   : > { %p593_p0 = pneg %p870_p9 }
  0x50   : > { %p594_p6 = pnand %p593_p0, %p592_p4 }
  0x52   : > { %p595_p12 = pneg %p594_p6 }
  0x54   : > { %p600_p11 = pnand %p598_p1, %p595_p12 }
  0x56   : > { %603 = shalt.err (!%p600_p11)
}
  0x57   : > { %s604_s6 = scalar_lea.vmem %s138_s9, 16  ;;  %s611_s17 = scalar_lea.vmem %s138_s9, 32 }
  0x58   : > { %p605_p13 = scmp.ne.s32.totalorder %s138_s9, %s604_s6  ;;  %p612_p5 = scmp.lt.s32.totalorder %s138_s9, %s138_s9 }
  0x59   : > { %p613_p8 = scmp.lt.s32.totalorder %s611_s17, %s604_s6 }
  0x5a   : > { %p607_p3 = pnand %p605_p13, %p593_p0 }
  0x5b   : > { %p614_p7 = por %p613_p8, %p612_p5 }
  0x5c   : > { %p608_p2 = pneg %p607_p3 }
  0x5e   : > { %p615_p10 = pnand %p614_p7, %p608_p2 }
  0x60   : > { %618 = shalt.err (!%p615_p10)
}
  0x61   : > { %478 = dma.hbm_to_vmem [thread:$0]  (!%p870_p9), %s960_s0, 16, %s138_s9, [#allocation3]  }
  0x62   : > { %p978_p4 = scmp.ne.s32.totalorder %s973_s7, 0 }
  0x63   : > { %p979_p6 = scmp.eq.s32.totalorder (!%p978_p4), %s802_s20, 0 }
  0x64   : > { %186 = sbr.rel (%p978_p4) target bundleno = 505 (0x1f9), region = 32 }
  0x6b   : > { %664 = dma.done.wait (%p979_p6), [#allocation3], 16   ;;  %p980_p0 = pmov %p979_p6 }
  0x6c   : > { %s192_s27 = sand.u32 1, %s802_s20   ;;  %s194_s4 = sand.u32 1, %s681_s13  }
  0x6d   : > { %666 = vsyncadd (%p980_p0), [#allocation3], 4294967280  ;;  %s900_s5 = sshll.u32 %s194_s4, 3  ;;  %s193_s9 = scalar_lea.sflag [#allocation6], %s192_s27 }
  0x6e   : > { %s196_s8 = scalar_lea.vmem [#allocation5], %s900_s5  ;;  %p981_p10 = scmp.ne.s32.totalorder %s970_s24, 0 }
  0x70   : > { %668 = dma.done.wait (%p981_p10), %s193_s9, 256  }
  0x71   : > { %670 = vsyncadd (%p981_p10), %s193_s9, 4294967040  ;;  %v694_v0 = vmov 0.0   ;;  %vm695_vm0 = vmmov 0   ;;  %s205_s7 = scalar_lea.vmem [#allocation7], %s900_s5  ;;  %v233_v2 = vld [vmem:[%s196_s8] sm:$0xff]  ;;  %vm313_vm1 = vcmask 64512  }
  0x72   : > { %460 = vmatprep.subr.mxu0 %v694_v0  ;;  %462 = vmatprep.mubr.msk.f32.mxu0 %vm695_vm0, %v694_v0  ;;  %v242_v1 = vld [vmem:[%s205_s7] sm:$0xff]  ;;  %s455_s24 = sshll.u32 %s802_s20, 7  ;;  %s232_s22 = scalar_lea.vmem [#allocation8], %s900_s5 }
  0x73   : > { %v453_v3 = vld [vmem:[#allocation2] ss:$0 sm:$0xff]  ;;  %461 = vmatpush3.xpose.msra.mxu0 %v242_v1  ;;  %s338_s23 = sshll.u32 %s232_s22, 4  ;;  %s914_s11 = scalar_lea.hbm %s963_s3, %s455_s24  ;;  %s916_s23 = int_to_ptr.vmem [resolvable:$true] %s338_s23 }
  0x74   : > { %v241_v4 = vmul.f32 %v453_v3, %v233_v2  ;;  %s325_s30 = scalar_lea.sflag [#allocation4], %s194_s4  ;;  %s619_s20 = scalar_lea.vmem %s916_s23, 128 }
  0x75   : > { %p620_p9 = scmp.ne.s32.totalorder %s916_s23, %s619_s20  ;;  %p982_p12 = scmp.ne.s32.totalorder %s971_s25, 0 }
  0x76   : > { %463 = vmatmul.mubr.f32.vlgmr.msra.gmra.mrb[0].mxu0 %v241_v4  ;;  %s696_s28 = smov [#allocation8]  }
  0x77   : > { %p621_p1 = pnand %p620_p9, %p982_p12  ;;  %s623_s6 = sshll.u32 %s696_s28, 4  ;;  %s624_s6 = int_to_ptr.vmem [resolvable:$false] %s623_s6 }
  0x78   : > { %s625_s17 = scalar_lea.vmem %s624_s6, 256  ;;  %p626_p13 = scmp.lt.s32.totalorder %s916_s23, %s624_s6 }
  0x79   : > { %p622_p11 = pneg %p621_p1  ;;  %p627_p3 = scmp.lt.s32.totalorder %s625_s17, %s619_s20 }
  0x7b   : > { %p628_p2 = por %p627_p3, %p626_p13 }
  0x7d   : > { %p629_p5 = pnand %p628_p2, %p622_p11 }
 0x149   : > { %v309_v5 = vpop.f32.mrb[0].mxu0 }
 0x14a   : > { %v464_v6 = vpop.f32.mrb[1].mxu0  ;;  %v314_v7 = vsel %vm313_vm1, %v309_v5, 0.0 }
 0x14b   : > { %315 = vadd.xlane.f32.xlu0 %v314_v7 }
 0x1d8   : > { %v316_v8 = vpop.xlane.xlu0 %315 }
 0x1d9   : > { %v317_v9 = vand.u32 2147483647, %v316_v8 }
 0x1db   : > { %529 = vrcp.f32 %v317_v9  ;;  %vm318_vm2 = vcmp.gt.f32.partialorder %v317_v9, 10000.0 }
 0x1e5   : > { %v530_v10 = vpop.eup %529 }
 0x1e6   : > { %v320_v11 = vmul.f32 10000.0, %v530_v10 }
 0x1e8   : > { %v321_v12 = vsel %vm318_vm2, %v320_v11, 1.0 }
 0x1e9   : > { %v322_v13 = vmul.f32 %v321_v12, %v309_v5 }
 0x1eb   : > { %323 = vst.msk [vmem:[%s232_s22] sm:$0xff] %vm313_vm1, %v322_v13 }
 0x1ec   : > { %632 = shalt.err (!%p629_p5)
}
 0x1ed   : > { %s633_s18 = scalar_lea.hbm %s914_s11, 128  ;;  %s637_s4 = scalar_lea.hbm %s963_s3, 256 }
 0x1ee   : > { %p634_p8 = scmp.ne.s32.totalorder %s914_s11, %s633_s18  ;;  %p638_p6 = scmp.lt.u32.totalorder %s914_s11, %s963_s3 }
 0x1ef   : > { %p639_p0 = scmp.lt.u32.totalorder %s637_s4, %s633_s18  ;;  %p641_p9 = scmp.lt.u32.totalorder %s633_s18, %s914_s11 }
 0x1f0   : > { %p635_p7 = pnand %p634_p8, %p982_p12 }
 0x1f1   : > { %p640_p10 = por %p639_p0, %p638_p6 }
 0x1f2   : > { %p636_p4 = pneg %p635_p7 }
 0x1f3   : > { %p642_p1 = por %p641_p9, %p640_p10 }
 0x1f5   : > { %p643_p11 = pnand %p642_p1, %p636_p4 }
 0x1f7   : > { %646 = shalt.err (!%p643_p11)
}
 0x1f8   : > { %473 = dma.vmem_to_hbm [thread:$0]  (%p982_p12), %s916_s23, 128, %s914_s11, %s325_s30  }
 0x1f9 PF: > { %s350_s8 = sand.u32 1, %s677_s12   ;;  %p983_p13 = scmp.ne.s32.totalorder %s972_s26, 0 }
 0x1fa   : > { %p984_p3 = scmp.ge.s32.totalorder %s689_s15, 2  ;;  %s351_s7 = scalar_lea.sflag [#allocation4], %s350_s8 }
 0x1fc   : > { %p487_p2 = pnand %p984_p3, %p983_p13 }
 0x1fe   : > { %672 = dma.done.wait (!%p487_p2), %s351_s7, 128  }
 0x1ff   : > { %674 = vsyncadd (!%p487_p2), %s351_s7, 4294967168  ;;  %p17_p5 = scmp.ge.s32.totalorder %s738_s16, 4   ;;  %s985_s12 = smov %s681_s13 }
 0x200   : > { %s986_s13 = smov %s685_s14  ;;  %s987_s14 = smov %s749_s19 }
 0x201   : > { %s988_s15 = smov %s738_s16  ;;  %19 = sbr.rel (!%p17_p5) target bundleno = 6 (0x6), region = 93 }
 0x208   :  { %356 = vsyncpa [#allocation3], 1 }
 0x209   :  { %358 = vsyncpa [#allocation3 + $0x1], 1 }
 0x20a   :  { %359 = vsyncpa [#allocation6], 1 }
 0x20b   :  { %361 = vsyncpa [#allocation6 + $0x1], 1 }
 0x20c   :  { %362 = vsyncpa [#allocation4], 1 }
 0x20d   :  { %364 = vsyncpa [#allocation4 + $0x1], 1 }

</bundles_post_ra>
